<compile_context>
chip_gen: v5e
topology: v5e:2x2
jax: 0.10.0
libtpu: 0.0.40
codegen_flags: <defaults>
</compile_context>

<pallas_src>
import functools
import numpy as np
import jax
import jax.numpy as jnp
from jax import lax
from jax.experimental import pallas as pl
from jax.experimental.pallas import tpu as pltpu


def _round_up(n, m):
    return ((n + m - 1) // m) * m


def _pick_tb(b):
    # Largest batch block that still leaves >= 2 parallel grid steps (v7x megacore).
    for t in (8, 4, 2):
        if b % t == 0 and b // t >= 2:
            return t
    return 1


def aa_group_kernel(xt_ref, rmat_ref, gw_ref, beff_ref, o_ref, *, hop, kk):
    """Fused densePool + folded (grouped conv -> 1x1 conv) for TB batch elements.

    xt_ref  : (TB, Hpad, CWpad)     zero-padded input, image rows on contraction axis
    rmat_ref: (Rpad, Hpad)          row-pool matrix (both row shifts, 0.5 weights)
    gw_ref  : (CWpad, 2*K*Npad)     wide folded weights (col-pool + grouped conv + 1x1)
    beff_ref: (1, Npad)             folded bias (zero in padded lanes)
    o_ref   : (TB, Hc, Npad)        rows = y, cols = o*Wc + x (lane-padded to Npad)
    """
    tb = xt_ref.shape[0]
    rpad = rmat_ref.shape[0]
    hc = o_ref.shape[1]
    npad = o_ref.shape[2]

    rmat = rmat_ref[...]
    gw = gw_ref[...]
    bias = beff_ref[...]                                   # (1, npad)

    # Row pooling (both row-shift variants) for every batch element in this block.
    t1s = [jnp.dot(rmat, xt_ref[b], preferred_element_type=jnp.float32)
           for b in range(tb)]
    t1 = t1s[0] if tb == 1 else jnp.concatenate(t1s, axis=0)   # (tb*rpad, CWpad)

    # ONE wide-N MXU matmul: column pooling + grouped conv + 1x1 conv all folded into
    # gw; each Npad-wide sub-block corresponds to one (row-shift a, kernel-row kh).
    wide = jnp.dot(t1, gw, preferred_element_type=jnp.float32)  # (tb*rpad, 2K*npad)

    for b in range(tb):
        base = b * rpad
        acc = bias                                          # broadcasts to (hc, npad)
        idx = 0
        for a in range(2):
            for kh in range(kk):
                r0 = base + a * hop + kh
                acc = acc + wide[r0:r0 + hc, idx * npad:(idx + 1) * npad]
                idx += 1
        o_ref[b] = acc.astype(o_ref.dtype)


@functools.partial(jax.jit, static_argnames=("padding",))
def aa_group_forward(x, w1, b1, w2, b2, padding=0):
    B, C, H, W = x.shape
    Ho, Wo = H // 2, W // 2
    Cout_g, Cg, K, _ = w1.shape            # grouped conv weight (ceil_ch, 4, K, K)
    Cout = w2.shape[0]
    per = Cout_g // C
    pd = padding
    Hop, Wop = Ho + 2 * pd, Wo + 2 * pd    # pooled spatial incl. conv padding
    Hc, Wc = Hop - K + 1, Wop - K + 1      # conv output spatial
    Hp, Wp = H + 1, W + 1                  # input padded by one zero row/col

    # ---- hardware-friendly padded dims ----
    Hpad = _round_up(Hp, 8)                # sublane multiple for the input tile
    CWpad = _round_up(C * Wp, 128)         # lane multiple for the contraction dim
    Npad = _round_up(Cout * Wc, 128)       # lane-dense output sub-block width
    Rpad = _round_up(2 * Hop, 8)
    TB = _pick_tb(B)

    # ---- input slab (B, Hpad, CWpad): rows on contraction axis, zero padded ----
    xp = jnp.pad(x, ((0, 0), (0, 0), (0, 1), (0, 1)))
    xt = xp.transpose(0, 2, 1, 3).reshape(B, Hp, C * Wp)
    xt = jnp.pad(xt, ((0, 0), (0, Hpad - Hp), (0, CWpad - C * Wp)))

    # ---- constant pooling matrices (trace-time numpy -> XLA constants) ----
    rmat = np.zeros((Rpad, Hpad), np.float32)
    for a in range(2):                     # a = down-shift
        for i in range(Ho):
            rmat[a * Hop + pd + i, 2 * i + a] += 0.5
            rmat[a * Hop + pd + i, 2 * i + a + 1] += 0.5
    cm1 = np.zeros((Wp, 2 * Wop), np.float32)
    for b in range(2):                     # b = right-shift
        for j in range(Wo):
            cm1[2 * j + b, b * Wop + pd + j] += 0.5
            cm1[2 * j + b + 1, b * Wop + pd + j] += 0.5
    cmat = np.zeros((C * Wp, C * 2 * Wop), np.float32)
    for c in range(C):
        cmat[c * Wp:(c + 1) * Wp, c * 2 * Wop:(c + 1) * 2 * Wop] = cm1

    # ---- fold grouped conv + 1x1 conv into effective weights ----
    w2m = w2.reshape(Cout, Cout_g).astype(jnp.float32)
    w1r = w1.reshape(C, per, Cg, K, K).astype(jnp.float32)
    w2r = w2m.reshape(Cout, C, per)
    weff = jnp.einsum('ocp,cpvhw->ocvhw', w2r, w1r)          # (Cout, C, 4, K, K)
    weff_r = weff.reshape(Cout, C, 2, 2, K, K)               # variant v -> (a, b)
    beff = b2.astype(jnp.float32) + w2m @ b1.astype(jnp.float32)

    # Weight "im2col" along the kernel-column axis, then fold in the col-pool matrix.
    dsel = np.zeros((K, Wop, Wc), np.float32)
    for kw in range(K):
        for xc in range(Wc):
            dsel[kw, xc + kw, xc] = 1.0
    gmat = jnp.einsum('ocabhw,wsx->ahcbsox', weff_r, jnp.asarray(dsel))
    gmat = gmat.reshape(2 * K, C * 2 * Wop, Cout * Wc)
    g2 = jnp.einsum('pq,aqn->apn', jnp.asarray(cmat), gmat)  # (2K, C*Wp, Cout*Wc)
    g2 = jnp.pad(g2, ((0, 0), (0, CWpad - C * Wp), (0, Npad - Cout * Wc)))
    gw = jnp.transpose(g2, (1, 0, 2)).reshape(CWpad, 2 * K * Npad)

    beff_row = jnp.zeros((1, Npad), jnp.float32).at[0, :Cout * Wc].set(
        jnp.repeat(beff, Wc))

    kernel = functools.partial(aa_group_kernel, hop=Hop, kk=K)
    out_flat = pl.pallas_call(
        kernel,
        out_shape=jax.ShapeDtypeStruct((B, Hc, Npad), x.dtype),
        grid=(B // TB,),
        in_specs=[
            pl.BlockSpec((TB, Hpad, CWpad), lambda i: (i, 0, 0)),
            pl.BlockSpec((Rpad, Hpad), lambda i: (0, 0)),
            pl.BlockSpec((CWpad, 2 * K * Npad), lambda i: (0, 0)),
            pl.BlockSpec((1, Npad), lambda i: (0, 0)),
        ],
        out_specs=pl.BlockSpec((TB, Hc, Npad), lambda i: (i, 0, 0)),
        compiler_params=pltpu.CompilerParams(
            dimension_semantics=("parallel",)),
    )(xt, jnp.asarray(rmat), gw, beff_row)

    # (B, Hc, Npad) -> strip lane padding -> (B, Cout, Hc, Wc)   (layout plumbing only)
    out = out_flat[:, :, :Cout * Wc].reshape(B, Hc, Cout, Wc).transpose(0, 2, 1, 3)
    return out


def ref_forward(x, w1, b1, w2, b2, padding=0):
    """Pure-JAX reference mirroring the PyTorch forward."""
    B, C, H, W = x.shape

    def pool(t):
        s = lax.reduce_window(t, 0.0, lax.add, (1, 1, 2, 2), (1, 1, 2, 2), 'VALID')
        return s / 4.0

    xr = jnp.pad(x, ((0, 0), (0, 0), (0, 0), (0, 1)))[:, :, :, 1:]
    xd = jnp.pad(x, ((0, 0), (0, 0), (0, 1), (0, 0)))[:, :, 1:, :]
    xrd = jnp.pad(x, ((0, 0), (0, 0), (0, 1), (0, 1)))[:, :, 1:, 1:]
    p0, p1, p2, p3 = pool(x), pool(xr), pool(xd), pool(xrd)
    st = jnp.stack([p0, p1, p2, p3], axis=2).reshape(B, C * 4,
                                                     p0.shape[2], p0.shape[3])
    h = lax.conv_general_dilated(st, w1, (1, 1),
                                 [(padding, padding), (padding, padding)],
                                 dimension_numbers=('NCHW', 'OIHW', 'NCHW'),
                                 feature_group_count=C)
    h = h + b1.reshape(1, -1, 1, 1)
    o = lax.conv_general_dilated(h, w2, (1, 1), 'VALID',
                                 dimension_numbers=('NCHW', 'OIHW', 'NCHW'))
    return o + b2.reshape(1, -1, 1, 1)


if __name__ == "__main__":
    # AA_Group(in_channel=4, out_channel=6, kernel_size=3, padding=0)
    B, Cin, H, W = 2, 4, 16, 16
    out_channel, K, padding = 6, 3, 0
    ceil_channel = (out_channel // Cin) * Cin + (Cin if out_channel % Cin else 0)  # 8

    key = jax.random.PRNGKey(0)
    k1, k2, k3, k4, k5 = jax.random.split(key, 5)
    x = jax.random.normal(k1, (B, Cin, H, W), jnp.float32)
    w1 = jax.random.normal(k2, (ceil_channel, 4, K, K), jnp.float32) * 0.1          # grouped
    b1 = jax.random.normal(k3, (ceil_channel,), jnp.float32) * 0.1
    w2 = jax.random.normal(k4, (out_channel, ceil_channel, 1, 1), jnp.float32) * 0.1  # 1x1
    b2 = jax.random.normal(k5, (out_channel,), jnp.float32) * 0.1

    out = jax.block_until_ready(aa_group_forward(x, w1, b1, w2, b2, padding=padding))
    ref = jax.block_until_ready(ref_forward(x, w1, b1, w2, b2, padding=padding))

    assert out.shape == (B, out_channel, (H // 2) - K + 1, (W // 2) - K + 1), out.shape
    assert jnp.allclose(out, ref, atol=1e-4, rtol=1e-4), \
        float(jnp.max(jnp.abs(out - ref)))
    print("KERNEL_OK")
</pallas_src>

<mosaic_0001>
module attributes {stable_mosaic.version = 11 : i64} {
  func.func @aa_group_kernel(%arg0: i32, %arg1: memref<1x24x128xf32, #tpu.memory_space<vmem>>, %arg2: memref<16x24xf32, #tpu.memory_space<vmem>>, %arg3: memref<128x768xf32, #tpu.memory_space<vmem>>, %arg4: memref<1x128xf32, #tpu.memory_space<vmem>>, %arg5: memref<1x6x128xf32, #tpu.memory_space<vmem>>) attributes {dimension_semantics = [#tpu.dimension_semantics<parallel>], iteration_bounds = array<i64: 2>, scalar_prefetch = 0 : i64, scratch_operands = 0 : i64, tpu.core_type = #tpu.core_type<tc>, window_params = [{transform_indices = @transform_0, window_bounds = array<i64: 1, 24, 128>}, {pipeline_mode = #tpu.pipeline_mode<synchronous>, transform_indices = @transform_1, window_bounds = array<i64: 16, 24>}, {pipeline_mode = #tpu.pipeline_mode<synchronous>, transform_indices = @transform_2, window_bounds = array<i64: 128, 768>}, {pipeline_mode = #tpu.pipeline_mode<synchronous>, transform_indices = @transform_3, window_bounds = array<i64: 1, 128>}, {transform_indices = @transform_4, window_bounds = array<i64: 1, 6, 128>}]} {
    %c0 = arith.constant 0 : index
    %c0_0 = arith.constant 0 : index
    %0 = vector.load %arg2[%c0, %c0_0] : memref<16x24xf32, #tpu.memory_space<vmem>>, vector<16x24xf32>
    %c0_1 = arith.constant 0 : index
    %c0_2 = arith.constant 0 : index
    %1 = vector.load %arg3[%c0_1, %c0_2] : memref<128x768xf32, #tpu.memory_space<vmem>>, vector<128x768xf32>
    %c0_3 = arith.constant 0 : index
    %c0_4 = arith.constant 0 : index
    %2 = vector.load %arg4[%c0_3, %c0_4] : memref<1x128xf32, #tpu.memory_space<vmem>>, vector<1x128xf32>
    %c0_5 = arith.constant 0 : index
    %c0_6 = arith.constant 0 : index
    %c0_7 = arith.constant 0 : index
    %3 = vector.load %arg1[%c0_5, %c0_6, %c0_7] : memref<1x24x128xf32, #tpu.memory_space<vmem>>, vector<1x24x128xf32>
    %4 = vector.shape_cast %3 : vector<1x24x128xf32> to vector<24x128xf32>
    %cst = arith.constant dense<0.000000e+00> : vector<16x128xf32>
    %5 = tpu.matmul %0, %4, %cst {dimension_numbers = #tpu.dot_dimension_numbers<[1], [0], [0], [1], [0, 0, 1, 1], [], []>} : vector<16x24xf32>, vector<24x128xf32>, vector<16x128xf32> -> vector<16x128xf32>
    %cst_8 = arith.constant dense<0.000000e+00> : vector<16x768xf32>
    %6 = tpu.matmul %5, %1, %cst_8 {dimension_numbers = #tpu.dot_dimension_numbers<[1], [0], [0], [1], [0, 0, 1, 1], [], []>} : vector<16x128xf32>, vector<128x768xf32>, vector<16x768xf32> -> vector<16x768xf32>
    %7 = vector.extract_strided_slice %6 {offsets = [0, 0], sizes = [6, 128], strides = [1, 1]} : vector<16x768xf32> to vector<6x128xf32>
    %8 = vector.broadcast %2 : vector<1x128xf32> to vector<6x128xf32>
    %9 = arith.addf %8, %7 : vector<6x128xf32>
    %10 = vector.extract_strided_slice %6 {offsets = [1, 128], sizes = [6, 128], strides = [1, 1]} : vector<16x768xf32> to vector<6x128xf32>
    %11 = arith.addf %9, %10 : vector<6x128xf32>
    %12 = vector.extract_strided_slice %6 {offsets = [2, 256], sizes = [6, 128], strides = [1, 1]} : vector<16x768xf32> to vector<6x128xf32>
    %13 = arith.addf %11, %12 : vector<6x128xf32>
    %14 = vector.extract_strided_slice %6 {offsets = [8, 384], sizes = [6, 128], strides = [1, 1]} : vector<16x768xf32> to vector<6x128xf32>
    %15 = arith.addf %13, %14 : vector<6x128xf32>
    %16 = vector.extract_strided_slice %6 {offsets = [9, 512], sizes = [6, 128], strides = [1, 1]} : vector<16x768xf32> to vector<6x128xf32>
    %17 = arith.addf %15, %16 : vector<6x128xf32>
    %18 = vector.extract_strided_slice %6 {offsets = [10, 640], sizes = [6, 128], strides = [1, 1]} : vector<16x768xf32> to vector<6x128xf32>
    %19 = arith.addf %17, %18 : vector<6x128xf32>
    %c0_9 = arith.constant 0 : index
    %c0_10 = arith.constant 0 : index
    %c0_11 = arith.constant 0 : index
    %20 = vector.load %arg5[%c0_9, %c0_10, %c0_11] : memref<1x6x128xf32, #tpu.memory_space<vmem>>, vector<1x6x128xf32>
    %21 = vector.shape_cast %20 : vector<1x6x128xf32> to vector<6x128xf32>
    %22 = vector.shape_cast %19 : vector<6x128xf32> to vector<1x6x128xf32>
    tpu.vector_store %arg5[%c0_9, %c0_10, %c0_11], %22 {strides = array<i32>} : memref<1x6x128xf32, #tpu.memory_space<vmem>>, vector<1x6x128xf32>,
    return
  }
  func.func @transform_0(%arg0: i32) -> (i32, i32, i32) {
    %c0_i32 = arith.constant 0 : i32
    %c0_i32_0 = arith.constant 0 : i32
    %c0_i32_1 = arith.constant 0 : i32
    return %arg0, %c0_i32, %c0_i32_0 : i32, i32, i32
  }
  func.func @transform_1(%arg0: i32) -> (i32, i32) {
    %c0_i32 = arith.constant 0 : i32
    %c0_i32_0 = arith.constant 0 : i32
    %c0_i32_1 = arith.constant 0 : i32
    return %c0_i32, %c0_i32_0 : i32, i32
  }
  func.func @transform_2(%arg0: i32) -> (i32, i32) {
    %c0_i32 = arith.constant 0 : i32
    %c0_i32_0 = arith.constant 0 : i32
    %c0_i32_1 = arith.constant 0 : i32
    return %c0_i32, %c0_i32_0 : i32, i32
  }
  func.func @transform_3(%arg0: i32) -> (i32, i32) {
    %c0_i32 = arith.constant 0 : i32
    %c0_i32_0 = arith.constant 0 : i32
    %c0_i32_1 = arith.constant 0 : i32
    return %c0_i32, %c0_i32_0 : i32, i32
  }
  func.func @transform_4(%arg0: i32) -> (i32, i32, i32) {
    %c0_i32 = arith.constant 0 : i32
    %c0_i32_0 = arith.constant 0 : i32
    %c0_i32_1 = arith.constant 0 : i32
    return %arg0, %c0_i32, %c0_i32_0 : i32, i32, i32
  }
}

</mosaic_0001>

<bundles_post_ra>
// kernel: aa_group_forward.1
= control target key start
LH: loop header
LB: loop body
LE: loop exit
PB: predicated region body
PF: predicated region fallthrough
CT: control target
= control target key end

     0   :  { %s621_s15 = smov 0   ;;  %s941_s0 = inlined_call_operand.vmem [shape: f32[2,24,128], index: 0, kind: input, shape index: {}]   ;;  %s942_s1 = inlined_call_operand.vmem [shape: f32[16,24], index: 1, kind: input, shape index: {}]   ;;  %s943_s2 = inlined_call_operand.vmem [shape: f32[128,768], index: 2, kind: input, shape index: {}]   ;;  %s944_s3 = inlined_call_operand.vmem [shape: f32[1,128], index: 3, kind: input, shape index: {}]   ;;  %s945_s4 = inlined_call_operand.vmem [shape: f32[2,6,128], index: 4, kind: output, shape index: {}]  }
   0x1 LB: > { %s535_s16 = sadd.s32 4294967295, %s594_s15   ;;  %p539_p0 = scmp.ge.s32.totalorder %s594_s15, 1  ;;  %s594_s15 = sphi %s621_s15, %s14_s15  }
   0x2   : > { %p162_p1 = scmp.lt.s32.totalorder %s594_s15, 3 }
   0x4   : > { %p163_p2 = pnand %p539_p0, %p162_p1 }
   0x5   : > { %p187_p3 = scmp.lt.s32.totalorder (!%p163_p2), %s535_s16, 1 }
   0x6   : > { %166 = sbr.rel (%p163_p2) target bundleno = 305 (0x131), region = 36 }
   0xb   : > { %v288_v0 = vld [vmem:[%s943_s2 + $0x2d0] sm:$0xff]  ;;  %v289_v1 = vld [vmem:[%s943_s2 + $0x2d8] sm:$0xff]  ;;  %v290_v2 = vld [vmem:[%s943_s2 + $0x2e0] sm:$0xff]  ;;  %s947_s16 = smov (!%p187_p3, %s535_s16), 1  ;;  %vm298_vm0 = vcmask 195584  }
   0xc   : > { %328 = vmatpush.msra.mxu1 %v288_v0  ;;  %350 = vmatpush.msra.mxu2 %v289_v1  ;;  %v282_v3 = vld [vmem:[%s943_s2 + $0x2a0] sm:$0xff]  ;;  %v283_v4 = vld [vmem:[%s943_s2 + $0x2a8] sm:$0xff]  ;;  %v284_v5 = vld [vmem:[%s943_s2 + $0x2b0] sm:$0xff]  ;;  %s578_s7 = smul.u32 24, %s947_s16  ;;  %s541_s27 = sshll.u32 %s947_s16, 3 }
   0xd   : > { %372 = vmatpush.msra.mxu3 %v290_v2  ;;  %v276_v6 = vld [vmem:[%s943_s2 + $0x270] sm:$0xff]  ;;  %v277_v7 = vld [vmem:[%s943_s2 + $0x278] sm:$0xff]  ;;  %v278_v8 = vld [vmem:[%s943_s2 + $0x280] sm:$0xff]  ;;  %s195_s30 = scalar_lea.vmem %s945_s4, %s541_s27 }
   0xe   : > { %329 = vmatpush.msra.mxu1 %v282_v3  ;;  %351 = vmatpush.msra.mxu2 %v283_v4  ;;  %v270_v9 = vld [vmem:[%s943_s2 + $0x240] sm:$0xff]  ;;  %v271_v10 = vld [vmem:[%s943_s2 + $0x248] sm:$0xff]  ;;  %s191_s18 = scalar_lea.vmem %s941_s0, %s578_s7  ;;  %v272_v11 = vld [vmem:[%s943_s2 + $0x250] sm:$0xff] }
   0xf   : > { %373 = vmatpush.msra.mxu3 %v284_v5  ;;  %v264_v12 = vld [vmem:[%s943_s2 + $0x210] sm:$0xff]  ;;  %v296_v14 = vld [vmem:[%s191_s18 + $0x8] sm:$0xff]  ;;  %v265_v15 = vld [vmem:[%s943_s2 + $0x218] sm:$0xff] }
  0x10   : > { %330 = vmatpush.msra.mxu1 %v276_v6  ;;  %352 = vmatpush.msra.mxu2 %v277_v7  ;;  %v297_v13 = vld [vmem:[%s191_s18 + $0x10] sm:$0xff]  ;;  %v266_v16 = vld [vmem:[%s943_s2 + $0x220] sm:$0xff]  ;;  %v259_v19 = vld [vmem:[%s943_s2 + $0x1e8] sm:$0xff] }
  0x11   : > { %374 = vmatpush.msra.mxu3 %v278_v8  ;;  %318 = vmatpush.msra.mxu0 %v297_v13  ;;  %v258_v17 = vld [vmem:[%s943_s2 + $0x1e0] sm:$0xff]  ;;  %v260_v21 = vld [vmem:[%s943_s2 + $0x1f0] sm:$0xff]  ;;  %v291_v22 = vld [vmem:[%s943_s2 + $0x2e8] sm:$0xff] }
  0x12   : > { %331 = vmatpush.msra.mxu1 %v270_v9  ;;  %353 = vmatpush.msra.mxu2 %v271_v10  ;;  %v295_v18 = vld [vmem:[%s191_s18] sm:$0xff]  ;;  %v252_v23 = vld [vmem:[%s943_s2 + $0x1b0] sm:$0xff]  ;;  %v253_v24 = vld [vmem:[%s943_s2 + $0x1b8] sm:$0xff] }
  0x13   : > { %375 = vmatpush.msra.mxu3 %v272_v11  ;;  %319 = vmatpush.msra.mxu0 %v296_v14  ;;  %v196_v20 = vld [vmem:[%s942_s1] sm:$0xff]  ;;  %v285_v26 = vld [vmem:[%s943_s2 + $0x2b8] sm:$0xff]  ;;  %v247_v28 = vld [vmem:[%s943_s2 + $0x188] sm:$0xff] }
  0x14   : > { %332 = vmatpush.msra.mxu1 %v264_v12  ;;  %354 = vmatpush.msra.mxu2 %v265_v15  ;;  %v254_v25 = vld [vmem:[%s943_s2 + $0x1c0] sm:$0xff]  ;;  %v248_v29 = vld [vmem:[%s943_s2 + $0x190] sm:$0xff]  ;;  %v279_v30 = vld [vmem:[%s943_s2 + $0x288] sm:$0xff] }
  0x15   : > { %376 = vmatpush.msra.mxu3 %v266_v16  ;;  %320 = vmatpush.msra.mxu0 %v295_v18  ;;  %v246_v27 = vld [vmem:[%s943_s2 + $0x180] sm:$0xff]  ;;  %v240_v31 = vld [vmem:[%s943_s2 + $0x150] sm:$0xff]  ;;  %v241_v32 = vld [vmem:[%s943_s2 + $0x158] sm:$0xff] }
  0x16   : > { %333 = vmatpush.msra.mxu1 %v258_v17  ;;  %355 = vmatpush.msra.mxu2 %v259_v19  ;;  %v242_v33 = vld [vmem:[%s943_s2 + $0x160] sm:$0xff]  ;;  %v273_v34 = vld [vmem:[%s943_s2 + $0x258] sm:$0xff]  ;;  %v197_v36 = vld [vmem:[%s942_s1 + $0x8] sm:$0xff] }
  0x17   : > { %542 = vmatmul.msk.f32.vlgmr.msra.gmra.mxu0 %vm298_vm0, %v196_v20  ;;  %377 = vmatpush.msra.mxu3 %v260_v21  ;;  %v234_v35 = vld [vmem:[%s943_s2 + $0x120] sm:$0xff]  ;;  %v235_v37 = vld [vmem:[%s943_s2 + $0x128] sm:$0xff]  ;;  %v236_v39 = vld [vmem:[%s943_s2 + $0x130] sm:$0xff] }
  0x18   : > { %394 = vmatpush.msrb.mxu0 %v291_v22  ;;  %334 = vmatpush.msra.mxu1 %v252_v23  ;;  %v267_v38 = vld [vmem:[%s943_s2 + $0x228] sm:$0xff]  ;;  %v228_v40 = vld [vmem:[%s943_s2 + $0xf0] sm:$0xff]  ;;  %v229_v41 = vld [vmem:[%s943_s2 + $0xf8] sm:$0xff] }
  0x19   : > { %356 = vmatpush.msra.mxu2 %v253_v24  ;;  %378 = vmatpush.msra.mxu3 %v254_v25  ;;  %v261_v42 = vld [vmem:[%s943_s2 + $0x1f8] sm:$0xff]  ;;  %v230_v43 = vld [vmem:[%s943_s2 + $0x100] sm:$0xff]  ;;  %v223_v45 = vld [vmem:[%s943_s2 + $0xc8] sm:$0xff] }
  0x1a   : > { %395 = vmatpush.msrb.mxu0 %v285_v26  ;;  %335 = vmatpush.msra.mxu1 %v246_v27  ;;  %v222_v44 = vld [vmem:[%s943_s2 + $0xc0] sm:$0xff]  ;;  %v255_v46 = vld [vmem:[%s943_s2 + $0x1c8] sm:$0xff]  ;;  %v224_v47 = vld [vmem:[%s943_s2 + $0xd0] sm:$0xff] }
  0x1b   : > { %357 = vmatpush.msra.mxu2 %v247_v28  ;;  %379 = vmatpush.msra.mxu3 %v248_v29  ;;  %v216_v48 = vld [vmem:[%s943_s2 + $0x90] sm:$0xff]  ;;  %v217_v49 = vld [vmem:[%s943_s2 + $0x98] sm:$0xff]  ;;  %v218_v51 = vld [vmem:[%s943_s2 + $0xa0] sm:$0xff] }
  0x1c   : > { %396 = vmatpush.msrb.mxu0 %v279_v30  ;;  %336 = vmatpush.msra.mxu1 %v240_v31  ;;  %v249_v50 = vld [vmem:[%s943_s2 + $0x198] sm:$0xff]  ;;  %v210_v52 = vld [vmem:[%s943_s2 + $0x60] sm:$0xff]  ;;  %v211_v53 = vld [vmem:[%s943_s2 + $0x68] sm:$0xff] }
  0x1d   : > { %358 = vmatpush.msra.mxu2 %v241_v32  ;;  %380 = vmatpush.msra.mxu3 %v242_v33  ;;  %v243_v54 = vld [vmem:[%s943_s2 + $0x168] sm:$0xff]  ;;  %v212_v55 = vld [vmem:[%s943_s2 + $0x70] sm:$0xff]  ;;  %v205_v57 = vld [vmem:[%s943_s2 + $0x38] sm:$0xff] }
  0x1e   : > { %397 = vmatpush.msrb.mxu0 %v273_v34  ;;  %337 = vmatpush.msra.mxu1 %v234_v35  ;;  %v204_v56 = vld [vmem:[%s943_s2 + $0x30] sm:$0xff]  ;;  %v237_v58 = vld [vmem:[%s943_s2 + $0x138] sm:$0xff]  ;;  %v206_v59 = vld [vmem:[%s943_s2 + $0x40] sm:$0xff] }
  0x1f   : > { %543 = vmatmul.msk.f32.gmra.mxu0 %vm298_vm0, %v197_v36  ;;  %359 = vmatpush.msra.mxu2 %v235_v37  ;;  %v198_v60 = vld [vmem:[%s943_s2] sm:$0xff]  ;;  %v199_v61 = vld [vmem:[%s943_s2 + $0x8] sm:$0xff]  ;;  %v200_v63 = vld [vmem:[%s943_s2 + $0x10] sm:$0xff] }
  0x20   : > { %398 = vmatpush.msrb.mxu0 %v267_v38  ;;  %381 = vmatpush.msra.mxu3 %v236_v39  ;;  %v231_v62 = vld [vmem:[%s943_s2 + $0x108] sm:$0xff]  ;;  %v292_v0 = vld [vmem:[%s943_s2 + $0x2f0] sm:$0xff]  ;;  %v225_v1 = vld [vmem:[%s943_s2 + $0xd8] sm:$0xff] }
  0x21   : > { %338 = vmatpush.msra.mxu1 %v228_v40  ;;  %360 = vmatpush.msra.mxu2 %v229_v41  ;;  %v293_v2 = vld [vmem:[%s943_s2 + $0x2f8] sm:$0xff]  ;;  %v286_v3 = vld [vmem:[%s943_s2 + $0x2c0] sm:$0xff]  ;;  %v219_v4 = vld [vmem:[%s943_s2 + $0xa8] sm:$0xff] }
  0x22   : > { %399 = vmatpush.msrb.mxu0 %v261_v42  ;;  %382 = vmatpush.msra.mxu3 %v230_v43  ;;  %v287_v5 = vld [vmem:[%s943_s2 + $0x2c8] sm:$0xff]  ;;  %v280_v6 = vld [vmem:[%s943_s2 + $0x290] sm:$0xff]  ;;  %v213_v7 = vld [vmem:[%s943_s2 + $0x78] sm:$0xff] }
  0x23   : > { %339 = vmatpush.msra.mxu1 %v222_v44  ;;  %361 = vmatpush.msra.mxu2 %v223_v45  ;;  %v281_v8 = vld [vmem:[%s943_s2 + $0x298] sm:$0xff]  ;;  %v274_v9 = vld [vmem:[%s943_s2 + $0x260] sm:$0xff]  ;;  %v207_v10 = vld [vmem:[%s943_s2 + $0x48] sm:$0xff] }
  0x24   : > { %400 = vmatpush.msrb.mxu0 %v255_v46  ;;  %383 = vmatpush.msra.mxu3 %v224_v47  ;;  %v275_v11 = vld [vmem:[%s943_s2 + $0x268] sm:$0xff]  ;;  %v268_v12 = vld [vmem:[%s943_s2 + $0x230] sm:$0xff]  ;;  %v201_v13 = vld [vmem:[%s943_s2 + $0x18] sm:$0xff] }
  0x25   : > { %340 = vmatpush.msra.mxu1 %v216_v48  ;;  %362 = vmatpush.msra.mxu2 %v217_v49  ;;  %v269_v14 = vld [vmem:[%s943_s2 + $0x238] sm:$0xff]  ;;  %v262_v15 = vld [vmem:[%s943_s2 + $0x200] sm:$0xff]  ;;  %v263_v16 = vld [vmem:[%s943_s2 + $0x208] sm:$0xff] }
  0x26   : > { %401 = vmatpush.msrb.mxu0 %v249_v50  ;;  %384 = vmatpush.msra.mxu3 %v218_v51  ;;  %v256_v17 = vld [vmem:[%s943_s2 + $0x1d0] sm:$0xff]  ;;  %v257_v18 = vld [vmem:[%s943_s2 + $0x1d8] sm:$0xff]  ;;  %v250_v19 = vld [vmem:[%s943_s2 + $0x1a0] sm:$0xff] }
  0x27   : > { %341 = vmatpush.msra.mxu1 %v210_v52  ;;  %363 = vmatpush.msra.mxu2 %v211_v53  ;;  %v251_v20 = vld [vmem:[%s943_s2 + $0x1a8] sm:$0xff]  ;;  %v244_v21 = vld [vmem:[%s943_s2 + $0x170] sm:$0xff]  ;;  %v245_v22 = vld [vmem:[%s943_s2 + $0x178] sm:$0xff] }
  0x28   : > { %402 = vmatpush.msrb.mxu0 %v243_v54  ;;  %385 = vmatpush.msra.mxu3 %v212_v55  ;;  %v238_v23 = vld [vmem:[%s943_s2 + $0x140] sm:$0xff]  ;;  %v239_v24 = vld [vmem:[%s943_s2 + $0x148] sm:$0xff]  ;;  %v232_v25 = vld [vmem:[%s943_s2 + $0x110] sm:$0xff] }
  0x29   : > { %342 = vmatpush.msra.mxu1 %v204_v56  ;;  %364 = vmatpush.msra.mxu2 %v205_v57  ;;  %v233_v26 = vld [vmem:[%s943_s2 + $0x118] sm:$0xff]  ;;  %v226_v27 = vld [vmem:[%s943_s2 + $0xe0] sm:$0xff]  ;;  %v227_v28 = vld [vmem:[%s943_s2 + $0xe8] sm:$0xff] }
  0x2a   : > { %403 = vmatpush.msrb.mxu0 %v237_v58  ;;  %386 = vmatpush.msra.mxu3 %v206_v59  ;;  %v220_v29 = vld [vmem:[%s943_s2 + $0xb0] sm:$0xff]  ;;  %v221_v30 = vld [vmem:[%s943_s2 + $0xb8] sm:$0xff]  ;;  %v214_v31 = vld [vmem:[%s943_s2 + $0x80] sm:$0xff] }
  0x2b   : > { %343 = vmatpush.msra.mxu1 %v198_v60  ;;  %365 = vmatpush.msra.mxu2 %v199_v61  ;;  %v215_v32 = vld [vmem:[%s943_s2 + $0x88] sm:$0xff]  ;;  %v208_v33 = vld [vmem:[%s943_s2 + $0x50] sm:$0xff]  ;;  %v209_v34 = vld [vmem:[%s943_s2 + $0x58] sm:$0xff] }
  0x2c   : > { %404 = vmatpush.msrb.mxu0 %v231_v62  ;;  %387 = vmatpush.msra.mxu3 %v200_v63  ;;  %v202_v35 = vld [vmem:[%s943_s2 + $0x20] sm:$0xff]  ;;  %v203_v36 = vld [vmem:[%s943_s2 + $0x28] sm:$0xff] }
  0x2d   : > { %416 = vmatpush.msrb.mxu1 %v292_v0  ;;  %562 = vmatpush.msrb.mxu2 %v293_v2  ;;  %v587_v45 = vld [vmem:[%s944_s3] ss:$0 sm:$0xff] }
  0x2e   : > { %546 = vmatpush.msrb.mxu3 %v292_v0  ;;  %405 = vmatpush.msrb.mxu0 %v225_v1 }
  0x2f   : > { %417 = vmatpush.msrb.mxu1 %v286_v3  ;;  %563 = vmatpush.msrb.mxu2 %v287_v5 }
  0x30   : > { %547 = vmatpush.msrb.mxu3 %v286_v3  ;;  %406 = vmatpush.msrb.mxu0 %v219_v4 }
  0x31   : > { %418 = vmatpush.msrb.mxu1 %v280_v6  ;;  %564 = vmatpush.msrb.mxu2 %v281_v8 }
  0x32   : > { %548 = vmatpush.msrb.mxu3 %v280_v6  ;;  %407 = vmatpush.msrb.mxu0 %v213_v7 }
  0x33   : > { %419 = vmatpush.msrb.mxu1 %v274_v9  ;;  %565 = vmatpush.msrb.mxu2 %v275_v11 }
  0x34   : > { %549 = vmatpush.msrb.mxu3 %v274_v9  ;;  %408 = vmatpush.msrb.mxu0 %v207_v10 }
  0x35   : > { %420 = vmatpush.msrb.mxu1 %v268_v12  ;;  %566 = vmatpush.msrb.mxu2 %v269_v14 }
  0x36   : > { %550 = vmatpush.msrb.mxu3 %v268_v12  ;;  %409 = vmatpush.msrb.mxu0 %v201_v13 }
  0x37   : > { %421 = vmatpush.msrb.mxu1 %v262_v15  ;;  %567 = vmatpush.msrb.mxu2 %v263_v16 }
  0x38   : > { %438 = vmatpush.msra.mxu0 %v293_v2  ;;  %551 = vmatpush.msrb.mxu3 %v262_v15 }
  0x39   : > { %422 = vmatpush.msrb.mxu1 %v256_v17  ;;  %568 = vmatpush.msrb.mxu2 %v257_v18 }
  0x3a   : > { %439 = vmatpush.msra.mxu0 %v287_v5  ;;  %552 = vmatpush.msrb.mxu3 %v256_v17 }
  0x3b   : > { %423 = vmatpush.msrb.mxu1 %v250_v19  ;;  %569 = vmatpush.msrb.mxu2 %v251_v20 }
  0x3c   : > { %440 = vmatpush.msra.mxu0 %v281_v8  ;;  %553 = vmatpush.msrb.mxu3 %v250_v19 }
  0x3d   : > { %424 = vmatpush.msrb.mxu1 %v244_v21  ;;  %570 = vmatpush.msrb.mxu2 %v245_v22 }
  0x3e   : > { %441 = vmatpush.msra.mxu0 %v275_v11  ;;  %554 = vmatpush.msrb.mxu3 %v244_v21 }
  0x3f   : > { %425 = vmatpush.msrb.mxu1 %v238_v23  ;;  %571 = vmatpush.msrb.mxu2 %v239_v24 }
  0x40   : > { %442 = vmatpush.msra.mxu0 %v269_v14  ;;  %555 = vmatpush.msrb.mxu3 %v238_v23 }
  0x41   : > { %426 = vmatpush.msrb.mxu1 %v232_v25  ;;  %572 = vmatpush.msrb.mxu2 %v233_v26 }
  0x42   : > { %443 = vmatpush.msra.mxu0 %v263_v16  ;;  %556 = vmatpush.msrb.mxu3 %v232_v25 }
  0x43   : > { %427 = vmatpush.msrb.mxu1 %v226_v27  ;;  %573 = vmatpush.msrb.mxu2 %v227_v28 }
  0x44   : > { %444 = vmatpush.msra.mxu0 %v257_v18  ;;  %557 = vmatpush.msrb.mxu3 %v226_v27 }
  0x45   : > { %428 = vmatpush.msrb.mxu1 %v220_v29  ;;  %574 = vmatpush.msrb.mxu2 %v221_v30 }
  0x46   : > { %445 = vmatpush.msra.mxu0 %v251_v20  ;;  %558 = vmatpush.msrb.mxu3 %v220_v29 }
  0x47   : > { %429 = vmatpush.msrb.mxu1 %v214_v31  ;;  %575 = vmatpush.msrb.mxu2 %v215_v32 }
  0x48   : > { %446 = vmatpush.msra.mxu0 %v245_v22  ;;  %559 = vmatpush.msrb.mxu3 %v214_v31 }
  0x49   : > { %430 = vmatpush.msrb.mxu1 %v208_v33  ;;  %576 = vmatpush.msrb.mxu2 %v209_v34 }
  0x4a   : > { %447 = vmatpush.msra.mxu0 %v239_v24  ;;  %560 = vmatpush.msrb.mxu3 %v208_v33 }
  0x4b   : > { %431 = vmatpush.msrb.mxu1 %v202_v35  ;;  %577 = vmatpush.msrb.mxu2 %v203_v36 }
  0x4c   : > { %448 = vmatpush.msra.mxu0 %v233_v26  ;;  %561 = vmatpush.msrb.mxu3 %v202_v35 }
  0x4e   : > { %449 = vmatpush.msra.mxu0 %v227_v28 }
  0x50   : > { %450 = vmatpush.msra.mxu0 %v221_v30 }
  0x52   : > { %451 = vmatpush.msra.mxu0 %v215_v32 }
  0x54   : > { %452 = vmatpush.msra.mxu0 %v209_v34 }
  0x56   : > { %453 = vmatpush.msra.mxu0 %v203_v36 }
  0x94   : > { %v322_v37 = vpop.f32.mrf.mxu0 }
  0x95   : > { %344 = vmatmul.f32.vlgmr.msra.gmra.mxu1 %v322_v37  ;;  %366 = vmatmul.f32.vlgmr.msra.gmra.mxu2 %v322_v37 }
  0x96   : > { %388 = vmatmul.f32.vlgmr.msra.gmra.mxu3 %v322_v37  ;;  %410 = vmatmul.f32.vlgmr.msrb.gmra.mxu0 %v322_v37 }
  0x9c   : > { %v325_v38 = vpop.f32.mrf.mxu0 }
  0x9d   : > { %347 = vmatmul.f32.gmra.mxu1 %v325_v38  ;;  %369 = vmatmul.f32.gmra.mxu2 %v325_v38 }
  0x9e   : > { %391 = vmatmul.f32.gmra.mxu3 %v325_v38  ;;  %412 = vmatmul.f32.gmra.mxu0 %v325_v38 }
  0xa5   : > { %432 = vmatmul.f32.vlgmr.msrb.gmra.mxu1 %v322_v37  ;;  %456 = vmatmul.f32.vlgmr.msrb.gmra.mxu2 %v325_v38 }
  0xa6   : > { %434 = vmatmul.f32.vlgmr.msrb.gmra.mxu3 %v325_v38  ;;  %454 = vmatmul.f32.vlgmr.msra.gmra.mxu0 %v322_v37 }
 0x112   : > { %v345_v39 = vpop.f32.mrf.mxu1 }
 0x113   : > { %v411_v40 = vpop.f32.mrf.mxu0  ;;  %v463_v47 = vadd.f32 %v587_v45, %v345_v39 }
 0x118   : > { %v367_v41 = vpop.f32.mrf.mxu2 }
 0x119   : > { %v389_v42 = vpop.f32.mrf.mxu3  ;;  %v465_v46 = vrot.slane %v367_v41, 1 }
 0x11a   : > { %v348_v43 = vpop.f32.mrf.mxu1  ;;  %v469_v53 = vrot.slane %v389_v42, 2 }
 0x11b   : > { %v413_v44 = vpop.f32.mrf.mxu0  ;;  %v467_v50 = vadd.f32 %v465_v46, %v463_v47 }
 0x11d   : > { %v471_v54 = vadd.f32 %v469_v53, %v467_v50 }
 0x11f   : > { %v472_v57 = vadd.f32 %v471_v54, %v413_v44 }
 0x120   : > { %v370_v48 = vpop.f32.mrf.mxu2 }
 0x121   : > { %v392_v49 = vpop.f32.mrf.mxu3 }
 0x122   : > { %v433_v51 = vpop.f32.mrf.mxu1 }
 0x123   : > { %v455_v52 = vpop.f32.mrf.mxu0 }
 0x128   : > { %v457_v56 = vpop.f32.mrf.mxu2 }
 0x129   : > { %v435_v55 = vpop.f32.mrf.mxu3  ;;  %v478_v60 = vrot.slane %v457_v56, 2 }
 0x12a   : > { %v474_v58 = vrot.slane %v435_v55, 1 }
 0x12c   : > { %v476_v59 = vadd.f32 %v474_v58, %v472_v57 }
 0x12e   : > { %v480_v61 = vadd.f32 %v478_v60, %v476_v59 }
 0x130   : > { %481 = vst [vmem:[%s195_s30] sm:$0x3f] %v480_v61 }
 0x131 PF: > { %s14_s15 = sadd.s32 1, %s594_s15  }
 0x132   : > { %p11_p4 = scmp.ge.s32.totalorder %s14_s15, 4  }
 0x134   :  { %13 = sbr.rel (!%p11_p4) target bundleno = 1 (0x1), region = 66 }

</bundles_post_ra>
